<compile_context>
chip_gen: v7x
topology: tpu7x:2x2x1
jax: 0.10.0
libtpu: 0.0.40
codegen_flags: <defaults>
</compile_context>

<pallas_src>
import functools
import math

import jax
import jax.numpy as jnp
from jax.experimental import pallas as pl
from jax.experimental.pallas import tpu as pltpu


def _round_up(x, m):
    return ((x + m - 1) // m) * m


# ----------------------------------------------------------------------------
# Kernels.  grid = (row tiles [parallel], relations [arbitrary], k tiles
# [arbitrary]).  Per step:  out_tile += A_r[i, k] @ XW_r[k]   (one MXU matmul)
# First step of each row tile: out_tile = bias (broadcast)    (accumulator init)
# ----------------------------------------------------------------------------
def _rgcn_kernel_resident_xw(a_ref, xw_ref, bias_ref, out_ref, *, tk, rel_stride):
    """XW is fully VMEM-resident as a flat [S*n_cols_pad, f_pad] slab."""
    r = pl.program_id(1)
    k = pl.program_id(2)

    @pl.when((r == 0) & (k == 0))
    def _():
        out_ref[...] = jnp.broadcast_to(bias_ref[...], out_ref.shape)

    row0 = pl.multiple_of(r * rel_stride + k * tk, 128)
    out_ref[...] += jnp.dot(a_ref[...], xw_ref[pl.ds(row0, tk), :],
                            preferred_element_type=jnp.float32)


def _rgcn_kernel_stream_xw(a_ref, xw_ref, bias_ref, out_ref):
    """Fallback: XW tile (tk, f_pad) streamed per grid step."""
    r = pl.program_id(1)
    k = pl.program_id(2)

    @pl.when((r == 0) & (k == 0))
    def _():
        out_ref[...] = jnp.broadcast_to(bias_ref[...], out_ref.shape)

    out_ref[...] += jnp.dot(a_ref[...], xw_ref[...],
                            preferred_element_type=jnp.float32)


# ----------------------------------------------------------------------------
# Wrapper.
# ----------------------------------------------------------------------------
def prepare_adjacency(adjs, *, tm=512, tk=2048, stream_dtype=jnp.bfloat16):
    """Pad (rectangular, per-axis) and cast the static per-graph adjacency ONCE.

    Returns (a_padded, tm, tk, num_nodes).  Hoist this out of the per-layer
    forward: the adjacency is constant per graph, so the pad+cast of the
    dominant [S, N, N] HBM stream should not be re-paid on every call.
    """
    support, N, _ = adjs.shape

    # Row tile: multiple of 16 (bf16 packs two rows per sublane).
    # Contraction tile: multiple of 128 (lane width).
    tm = max(16, min(_round_up(tm, 16), _round_up(N, 16)))
    tk = max(128, min(_round_up(tk, 128), _round_up(N, 128)))

    # Keep the double-buffered A tile within a conservative cross-generation
    # VMEM budget (v7x only has 64 MiB per TensorCore).
    sbytes = jnp.dtype(stream_dtype).itemsize
    while tk > 128 and 2 * tm * tk * sbytes > (16 << 20):
        tk = _round_up(tk // 2, 128)

    # Give the 'parallel' row axis at least two tiles when the graph allows it,
    # so both v7x TensorCores get work.
    if _round_up(N, tm) // tm < 2 and N > 16:
        tm = max(16, _round_up((N + 1) // 2, 16))

    n_rows_pad = _round_up(N, tm)
    n_cols_pad = _round_up(N, tk)

    a_p = adjs
    if (n_rows_pad, n_cols_pad) != (N, N):
        a_p = jnp.pad(a_p, ((0, 0), (0, n_rows_pad - N), (0, n_cols_pad - N)))

    # TODO(synk): optional int8 (v5e/v6e) / fp8-e4m3 (v7x) quantisation of the
    # adjacency stream would roughly halve the dominant HBM traffic again.
    return a_p.astype(stream_dtype), tm, tk, N


def rgcn_forward(x, adjs, basis, coef, bias, *, num_basis,
                 tm=512, tk=2048, stream_dtype=jnp.bfloat16,
                 adjs_prepared=None):
    """featureless=False path of RelationalGraphConvolution.forward.

    Pass `adjs_prepared = prepare_adjacency(adjs, ...)` to amortise the
    adjacency pad+cast across layers / calls (recommended).  When it is given,
    `adjs` may be None and the stream dtype is taken from the prepared array.
    """
    if adjs_prepared is None:
        adjs_prepared = prepare_adjacency(adjs, tm=tm, tk=tk,
                                          stream_dtype=stream_dtype)
    a_p, tm, tk, N = adjs_prepared
    stream_dtype = a_p.dtype
    support, n_rows_pad, n_cols_pad = a_p.shape

    F_in = x.shape[1]
    bias = bias.reshape(-1)
    F_out = bias.shape[0]

    # --- parameter glue: identical flat-weight construction to the PyTorch module
    if num_basis > 0:
        b3 = basis.reshape(num_basis, F_in, F_out).transpose(1, 0, 2)   # [F_in,B,F_out]
        weight = jnp.matmul(coef, b3)                                   # [F_in,S,F_out]
        weight = weight.reshape(F_in * support, F_out)                  # flat (torch layout)
    else:
        weight = basis                                                  # [F_in*S,F_out]
    # concat_r(A_r @ X) @ weight == sum_r A_r @ (X @ W_r),
    # with W_r = weight[r*F_in:(r+1)*F_in] matching the adj_mat concat layout.
    w_blocks = weight.reshape(support, F_in, F_out)
    xw = jnp.einsum('nf,sfo->sno', x.astype(jnp.float32),
                    w_blocks.astype(jnp.float32))                       # [S,N,F_out]

    # Lane-dense output columns; zero-pad XW rows to the padded contraction dim
    # (zero rows/cols are mathematically inert).
    f_pad = _round_up(F_out, 128)
    xw_p = jnp.pad(xw, ((0, 0), (0, n_cols_pad - N), (0, f_pad - F_out)))
    xw_p = xw_p.astype(stream_dtype)
    bias_p = jnp.pad(bias.astype(jnp.float32), (0, f_pad - F_out)).reshape(1, f_pad)

    sbytes = jnp.dtype(stream_dtype).itemsize
    xw_bytes = support * n_cols_pad * f_pad * sbytes
    xw_resident = xw_bytes <= (8 << 20)   # make XW VMEM-resident when it fits

    grid = (n_rows_pad // tm, support, n_cols_pad // tk)

    if xw_resident:
        xw_arg = xw_p.reshape(support * n_cols_pad, f_pad)
        kernel = functools.partial(_rgcn_kernel_resident_xw,
                                   tk=tk, rel_stride=n_cols_pad)
        # Full-extent block, constant index map -> loaded once, sliced in-kernel.
        xw_spec = pl.BlockSpec((support * n_cols_pad, f_pad),
                               lambda i, r, k: (0, 0))
        xw_traffic = xw_bytes
        xw_vmem = 2 * xw_bytes
    else:
        xw_arg = xw_p
        kernel = _rgcn_kernel_stream_xw
        xw_spec = pl.BlockSpec((pl.Squeezed(), tk, f_pad),
                               lambda i, r, k: (r, k, 0))
        xw_traffic = grid[0] * xw_bytes
        xw_vmem = 2 * tk * f_pad * sbytes

    cost = pl.CostEstimate(
        flops=2 * support * n_rows_pad * n_cols_pad * f_pad,
        transcendentals=0,
        bytes_accessed=(support * n_rows_pad * n_cols_pad * sbytes   # A stream
                        + xw_traffic                                 # XW
                        + n_rows_pad * f_pad * 4))                   # out

    vmem_needed = (2 * tm * tk * sbytes        # double-buffered A tile
                   + xw_vmem                   # XW (resident or tile)
                   + 2 * tm * f_pad * 4        # output accumulator block
                   + 2 * f_pad * 4)            # bias
    vmem_limit = int(min(max(2 * vmem_needed, 32 << 20), 56 << 20))

    out = pl.pallas_call(
        kernel,
        out_shape=jax.ShapeDtypeStruct((n_rows_pad, f_pad), jnp.float32),
        grid_spec=pltpu.PrefetchScalarGridSpec(
            num_scalar_prefetch=0,
            grid=grid,
            in_specs=[
                # A_r tile (tm, tk), relation dim squeezed away.
                pl.BlockSpec((pl.Squeezed(), tm, tk), lambda i, r, k: (r, i, k)),
                xw_spec,
                # bias: tiny, resident (constant index map).
                pl.BlockSpec((1, f_pad), lambda i, r, k: (0, 0)),
            ],
            # Output block is the accumulator: resident across r and k.
            out_specs=pl.BlockSpec((tm, f_pad), lambda i, r, k: (i, 0)),
        ),
        compiler_params=pltpu.CompilerParams(
            dimension_semantics=("parallel", "arbitrary", "arbitrary"),
            vmem_limit_bytes=vmem_limit),
        cost_estimate=cost,
    )(a_p, xw_arg, bias_p)

    # TODO(synk): featureless=True branch (F.dropout row scaling of ones(N)) is
    # stochastic at call time and not implemented here.
    return out[:N, :F_out].astype(x.dtype)


def _rgcn_reference(x, adjs, basis, coef, bias, *, num_basis):
    """Pure-JNP transcription of the PyTorch forward (featureless=False)."""
    support, N, _ = adjs.shape
    F_in = x.shape[1]
    F_out = bias.reshape(-1).shape[0]
    adj_mat = jnp.concatenate([adjs[i] @ x for i in range(support)], axis=1)
    if num_basis > 0:
        w = jnp.matmul(coef, basis.reshape(num_basis, F_in, F_out).transpose(1, 0, 2))
        w = w.reshape(F_in * support, F_out)
        out = adj_mat @ w
    else:
        out = adj_mat @ basis
    return out + bias.reshape(-1)


if __name__ == "__main__":
    # Small, deterministic problem.
    N, F_in, F_out = 64, 32, 16
    support, num_basis = 3, 2

    key = jax.random.PRNGKey(0)
    k_x, k_a, k_b, k_c = jax.random.split(key, 4)

    x = jax.random.normal(k_x, (N, F_in), dtype=jnp.float32)
    adjs = jax.random.uniform(k_a, (support, N, N), dtype=jnp.float32)

    # Deterministic parameter init, same recipe as reset_parameters().
    stdv_b = 1.0 / math.sqrt(F_out)
    basis = jax.random.uniform(k_b, (F_in * num_basis, F_out),
                               minval=-stdv_b, maxval=stdv_b, dtype=jnp.float32)
    stdv_c = 1.0 / math.sqrt(num_basis)
    coef = jax.random.uniform(k_c, (support, num_basis),
                              minval=-stdv_c, maxval=stdv_c, dtype=jnp.float32)
    # reset_parameters() fills bias with 0; use a non-zero bias here to
    # actually exercise the bias-add path (forward just adds whatever bias).
    bias = jnp.arange(F_out, dtype=jnp.float32) * 0.01

    ref = _rgcn_reference(x, adjs, basis, coef, bias, num_basis=num_basis)

    # f32-stream path: tight numerical check against the reference.
    prep_f32 = prepare_adjacency(adjs, stream_dtype=jnp.float32)
    out_f32 = rgcn_forward(x, None, basis, coef, bias, num_basis=num_basis,
                           adjs_prepared=prep_f32)
    out_f32 = jax.block_until_ready(out_f32)
    assert out_f32.shape == (N, F_out)
    assert jnp.allclose(out_f32, ref, atol=1e-3, rtol=1e-3), "f32 mismatch vs reference"

    # bf16 fast path with the adjacency pad+cast hoisted: prepared once, reused
    # across calls (this is the recommended multi-layer usage).
    prep_bf16 = prepare_adjacency(adjs)
    out_a = rgcn_forward(x, None, basis, coef, bias, num_basis=num_basis,
                         adjs_prepared=prep_bf16)
    out_b = rgcn_forward(x, None, basis, coef, bias, num_basis=num_basis,
                         adjs_prepared=prep_bf16)   # reuse: no second pad+cast
    out_a = jax.block_until_ready(out_a)
    out_b = jax.block_until_ready(out_b)
    assert out_a.shape == (N, F_out)
    assert jnp.allclose(out_a, ref, atol=1e-1, rtol=5e-2), "bf16 mismatch vs reference"
    assert jnp.allclose(out_a, out_b), "hoisted-adjacency reuse mismatch"

    # Convenience (un-hoisted) path still works.
    out_c = jax.block_until_ready(
        rgcn_forward(x, adjs, basis, coef, bias, num_basis=num_basis))
    assert jnp.allclose(out_c, ref, atol=1e-1, rtol=5e-2), "convenience path mismatch"

    print("KERNEL_OK")
</pallas_src>

<mosaic_0001>
module attributes {stable_mosaic.version = 11 : i64} {
  func.func @_rgcn_kernel_resident_xw(%arg0: i32, %arg1: i32, %arg2: i32, %arg3: memref<1x32x128xf32, #tpu.memory_space<vmem>>, %arg4: memref<384x128xf32, #tpu.memory_space<vmem>>, %arg5: memref<1x128xf32, #tpu.memory_space<vmem>>, %arg6: memref<32x128xf32, #tpu.memory_space<vmem>>) attributes {dimension_semantics = [#tpu.dimension_semantics<parallel>, #tpu.dimension_semantics<arbitrary>, #tpu.dimension_semantics<arbitrary>], iteration_bounds = array<i64: 2, 3, 1>, scalar_prefetch = 0 : i64, scratch_operands = 0 : i64, tpu.core_type = #tpu.core_type<tc>, window_params = [{transform_indices = @transform_0, window_bounds = array<i64: 1, 32, 128>}, {pipeline_mode = #tpu.pipeline_mode<synchronous>, transform_indices = @transform_1, window_bounds = array<i64: 384, 128>}, {pipeline_mode = #tpu.pipeline_mode<synchronous>, transform_indices = @transform_2, window_bounds = array<i64: 1, 128>}, {transform_indices = @transform_3, window_bounds = array<i64: 32, 128>}]} {
    %c0_i32 = arith.constant 0 : i32
    %0 = arith.cmpi eq, %arg1, %c0_i32 : i32
    %c0_i32_0 = arith.constant 0 : i32
    %1 = arith.cmpi eq, %arg2, %c0_i32_0 : i32
    %2 = arith.andi %0, %1 : i1
    %3 = arith.extui %2 : i1 to i32
    %c0_i32_1 = arith.constant 0 : i32
    %4 = arith.cmpi ne, %3, %c0_i32_1 : i32
    scf.if %4 {
      %c0_10 = arith.constant 0 : index
      %c0_11 = arith.constant 0 : index
      %17 = vector.load %arg5[%c0_10, %c0_11] : memref<1x128xf32, #tpu.memory_space<vmem>>, vector<1x128xf32>
      %18 = vector.shape_cast %17 : vector<1x128xf32> to vector<1x128xf32>
      %19 = vector.broadcast %18 : vector<1x128xf32> to vector<32x128xf32>
      %c0_12 = arith.constant 0 : index
      %c0_13 = arith.constant 0 : index
      %20 = vector.load %arg6[%c0_12, %c0_13] : memref<32x128xf32, #tpu.memory_space<vmem>>, vector<32x128xf32>
      tpu.vector_store %arg6[%c0_12, %c0_13], %19 {strides = array<i32>} : memref<32x128xf32, #tpu.memory_space<vmem>>, vector<32x128xf32>,
    } else {
    }
    %c128_i32 = arith.constant 128 : i32
    %5 = arith.muli %arg1, %c128_i32 : i32
    %c128_i32_2 = arith.constant 128 : i32
    %6 = arith.muli %arg2, %c128_i32_2 : i32
    %7 = arith.addi %5, %6 : i32
    %8 = tpu.assume_multiple %7, 128 : i32
    %c0 = arith.constant 0 : index
    %c0_3 = arith.constant 0 : index
    %9 = vector.load %arg6[%c0, %c0_3] : memref<32x128xf32, #tpu.memory_space<vmem>>, vector<32x128xf32>
    %c0_4 = arith.constant 0 : index
    %c0_5 = arith.constant 0 : index
    %c0_6 = arith.constant 0 : index
    %10 = vector.load %arg3[%c0_4, %c0_5, %c0_6] : memref<1x32x128xf32, #tpu.memory_space<vmem>>, vector<1x32x128xf32>
    %11 = vector.shape_cast %10 : vector<1x32x128xf32> to vector<32x128xf32>
    %12 = arith.index_cast %8 : i32 to index
    %c0_7 = arith.constant 0 : index
    %13 = vector.load %arg4[%12, %c0_7] : memref<384x128xf32, #tpu.memory_space<vmem>>, vector<128x128xf32>
    %cst = arith.constant dense<0.000000e+00> : vector<32x128xf32>
    %14 = tpu.matmul %11, %13, %cst {dimension_numbers = #tpu.dot_dimension_numbers<[1], [0], [0], [1], [0, 0, 1, 1], [], []>} : vector<32x128xf32>, vector<128x128xf32>, vector<32x128xf32> -> vector<32x128xf32>
    %15 = arith.addf %9, %14 : vector<32x128xf32>
    %c0_8 = arith.constant 0 : index
    %c0_9 = arith.constant 0 : index
    %16 = vector.load %arg6[%c0_8, %c0_9] : memref<32x128xf32, #tpu.memory_space<vmem>>, vector<32x128xf32>
    tpu.vector_store %arg6[%c0_8, %c0_9], %15 {strides = array<i32>} : memref<32x128xf32, #tpu.memory_space<vmem>>, vector<32x128xf32>,
    return
  }
  func.func @transform_0(%arg0: i32, %arg1: i32, %arg2: i32) -> (i32, i32, i32) {
    %c0_i32 = arith.constant 0 : i32
    return %arg1, %arg0, %arg2 : i32, i32, i32
  }
  func.func @transform_1(%arg0: i32, %arg1: i32, %arg2: i32) -> (i32, i32) {
    %c0_i32 = arith.constant 0 : i32
    %c0_i32_0 = arith.constant 0 : i32
    %c0_i32_1 = arith.constant 0 : i32
    return %c0_i32, %c0_i32_0 : i32, i32
  }
  func.func @transform_2(%arg0: i32, %arg1: i32, %arg2: i32) -> (i32, i32) {
    %c0_i32 = arith.constant 0 : i32
    %c0_i32_0 = arith.constant 0 : i32
    %c0_i32_1 = arith.constant 0 : i32
    return %c0_i32, %c0_i32_0 : i32, i32
  }
  func.func @transform_3(%arg0: i32, %arg1: i32, %arg2: i32) -> (i32, i32) {
    %c0_i32 = arith.constant 0 : i32
    %c0_i32_0 = arith.constant 0 : i32
    return %arg0, %c0_i32 : i32, i32
  }
}

</mosaic_0001>

<bundles_post_ra>
// kernel: tpu_custom_call.1
= control target key start
LH: loop header
LB: loop body
LE: loop exit
PB: predicated region body
PF: predicated region fallthrough
CT: control target
= control target key end

     0   :  { %s1266_s0 = inlined_call_operand.hbm [shape: f32[3,64,128], index: 0, kind: input, shape index: {}]   ;;  %s1267_s1 = inlined_call_operand.hbm [shape: f32[384,128], index: 1, kind: input, shape index: {}]   ;;  %s1268_s2 = inlined_call_operand.vmem [shape: f32[1,128], index: 2, kind: input, shape index: {}]   ;;  %s1269_s3 = inlined_call_operand.hbm [shape: f32[64,128], index: 3, kind: output, shape index: {}]  }
   0x1   :  { %1284 = sst [smem:[#allocation16_spill]] %s1267_s1 }
   0x2   :  { %1285 = sst [smem:[#allocation17_spill]] %s1269_s3 }
   0x3   :  { %8 = vsyncpa [#allocation3], 0 }
   0x4   :  { %10 = vsyncpa [#allocation3 + $0x1], 0 }
   0x5   :  { %11 = vsyncpa [#allocation6], 0 }
   0x6   :  { %12 = vsyncpa [#allocation4], 0 }
   0x7   :  { %14 = vsyncpa [#allocation4 + $0x1], 0  ;;  %s948_s12 = smov 0   ;;  %s950_s13 = smov 0  }
   0x8   :  { %s952_s14 = smov 0   ;;  %s954_s15 = smov 0  }
   0x9   :  { %s956_s16 = smov 0   ;;  %s958_s17 = smov 0  }
   0xa   :  { %s960_s18 = smov 0   ;;  %s962_s19 = smov 0  }
   0xb   :  { %s964_s20 = smov 0   ;;  %s966_s21 = smov 0  }
   0xc   :  { %s968_s22 = smov 0  }
   0xd LB: > { %1286 = sst [smem:[#allocation11_spill]] %s879_s12  ;;  %s489_s23 = sadd.s32 4294967295, %s919_s22   ;;  %s919_s22 = sphi %s968_s22, %s20_s22   ;;  %s915_s21 = sphi %s966_s21, %s1322_s21   ;;  %s911_s20 = sphi %s964_s20, %s1321_s20   ;;  %s907_s19 = sphi %s962_s19, %s1320_s19   ;;  %s903_s18 = sphi %s960_s18, %s1319_s18   ;;  %s899_s17 = sphi %s958_s17, %s1318_s17   ;;  %s895_s16 = sphi %s956_s16, %s1317_s16   ;;  %s891_s15 = sphi %s954_s15, %s1316_s15   ;;  %s887_s14 = sphi %s952_s14, %s1315_s14   ;;  %s883_s13 = sphi %s950_s13, %s1314_s13   ;;  %s879_s12 = sphi %s948_s12, %s1313_s12  }
   0xe   : > { %s490_s24 = sadd.s32 4294967294, %s919_s22   ;;  %p63_p0 = scmp.ne.s32.totalorder %s895_s16, %s891_s15 }
   0xf   : > { %p1004_p1 = scmp.eq.s32.totalorder %s489_s23, 0  ;;  %s118_s26 = sadd.s32 1, %s887_s14 }
  0x10   : > { %p128_p2 = scmp.ne.s32.totalorder %s887_s14, %s883_s13  ;;  %p129_p4 = scmp.eq.s32.totalorder %s489_s23, 5 }
  0x11   : > { %s1287_s25 = scalar_select %p1004_p1, 1, 0 }
  0x12   : > { %p1013_p3 = por %p1004_p1, %p63_p0  ;;  %p134_p5 = scmp.ne.s32.totalorder %s883_s13, %s879_s12 }
  0x13   : > { %p135_p6 = scmp.eq.s32.totalorder %s490_s24, 5  ;;  %p1019_p7 = por %p129_p4, %p128_p2 }
  0x14   : > { %s1288_s27 = scalar_select %p1013_p3, 1, 0 }
  0x15   : > { %s1289_s28 = scalar_select %p1019_p7, 1, 0 }
  0x16   : > { %p491_p8 = scmp.ge.s32.totalorder %s919_s22, 1  ;;  %p1024_p9 = por %p135_p6, %p134_p5 }
  0x17   : > { %1290 = sst [smem:[#allocation12_spill]] %s1289_s28  ;;  %p142_p10 = scmp.lt.s32.totalorder %s919_s22, 7 }
  0x18   : > { %s1291_s29 = scalar_select %p1024_p9, 1, 0 }
  0x19   : > { %p1029_p11 = pnand %p491_p8, %p142_p10  ;;  %s921_s4 = smov [#allocation5]  }
  0x1a   : > { %1292 = sst [smem:[#allocation13_spill]] %s1291_s29  ;;  %s154_s5 = sshll.u32 %s921_s4, 4  ;;  %s155_s5 = int_to_ptr.vmem [resolvable:$true] %s154_s5 }
  0x1b   : > { %s1293_s30 = scalar_select %p1029_p11, 1, 0 }
  0x1c   : > { %p626_p12 = pneg %p1029_p11  ;;  %s1295_s1 = sld [smem:[#allocation16_spill]] }
  0x1e   : > { %p1037_p13 = pnand %p626_p12, %p1004_p1 }
  0x20   : > { %p737_p2 = pneg %p1037_p13 }
  0x22   : > { %s735_s9 = scalar_lea.hbm %s1295_s1, 6144 }
  0x23   : > { %p736_p0 = scmp.ne.s32.totalorder %s1295_s1, %s735_s9  ;;  %p742_p6 = scmp.lt.u32.totalorder %s735_s9, %s1295_s1 }
  0x25   : > { %p738_p4 = pnand %p737_p2, %p736_p0 }
  0x27   : > { %p739_p5 = pneg %p738_p4 }
  0x29   : > { %p744_p8 = pnand %p742_p6, %p739_p5 }
  0x2b   : > { %747 = shalt.err (!%p744_p8)
}
  0x2c   : > { %s748_s24 = scalar_lea.vmem %s155_s5, 6144  ;;  %p756_p7 = scmp.lt.s32.totalorder %s155_s5, %s155_s5 }
  0x2d   : > { %p749_p10 = scmp.ne.s32.totalorder %s155_s5, %s748_s24  ;;  %p757_p1 = scmp.lt.s32.totalorder %s748_s24, %s748_s24 }
  0x2f   : > { %p751_p12 = pnand %p749_p10, %p737_p2  ;;  %p758_p3 = por %p757_p1, %p756_p7 }
  0x31   : > { %p752_p9 = pneg %p751_p12 }
  0x33   : > { %p759_p11 = pnand %p758_p3, %p752_p9 }
  0x35   : > { %762 = shalt.err (!%p759_p11)
}
  0x36   : > { %s1275_s4 = smov 128   ;;  %s1276_s7 = smov 8  }
  0x37   : > { %629 = dma.hbm_to_vmem [thread:$0]  (!%p1037_p13), %s1295_s1, 6144, %s155_s5, [#allocation6], %s1275_s4, %s1275_s4, %s1276_s7  }
  0x38   : > { %s35_s10 = sadd.s32 1, %s911_s20  ;;  %s39_s11 = sadd.s32 1, %s915_s21 }
  0x39   : > { %p37_p1 = scmp.ge.s32.totalorder %s35_s10, 3  ;;  %s50_s15 = sadd.s32 1, %s899_s17 }
  0x3a   : > { %p57_p3 = scmp.ne.s32.totalorder %s899_s17, %s895_s16  ;;  %p58_p7 = scmp.eq.s32.totalorder %s919_s22, 0 }
  0x3b   : > { %s1324_s10 = smov (%p37_p1, %s35_s10), 0  ;;  %s1326_s11 = smov (!%p37_p1, %s39_s11), %s915_s21 }
  0x3c   : > { %1296 = sst [smem:[#allocation14_spill]] %s1324_s10  ;;  %s43_s6 = ssub.s32 %s911_s20, %s1324_s10 }
  0x3d   : > { %p41_p9 = scmp.ge.s32.totalorder %s1326_s11, 2  ;;  %p639_p11 = scmp.lt.s32.totalorder %s919_s22, 6 }
  0x3e   : > { %p1072_p13 = por %p58_p7, %p57_p3  ;;  %s171_s23 = sand.u32 1, %s899_s17  }
  0x3f   : > { %s1328_s11 = smov (%p41_p9, %s1326_s11), 0  ;;  %s494_s24 = sshll.u32 %s171_s23, 5 }
  0x40   : > { %1298 = sst [smem:[#allocation15_spill]] %s1328_s11  ;;  %s44_s8 = ssub.s32 %s915_s21, %s1328_s11 }
  0x41   : > { %s45_s9 = sor.u32 %s44_s8, %s43_s6  ;;  %p116_p0 = scmp.eq.s32.totalorder %s44_s8, 0 }
  0x42   : > { %p48_p2 = scmp.eq.s32.totalorder %s45_s9, 0  ;;  %s495_s4 = sshll.u32 %s915_s21, 2 }
  0x43   : > { %s1085_s7 = scalar_select %p116_p0, %s887_s14, %s118_s26  }
  0x44   : > { %s1088_s1 = scalar_select %p48_p2, %s899_s17, %s50_s15  }
  0x45   : > { %s496_s10 = sshll.u32 %s911_s20, 3  ;;  %s175_s29 = scalar_lea.vmem [#allocation2], %s494_s24 }
  0x46   : > { %s185_s12 = sshll.u32 %s175_s29, 4  ;;  %s182_s3 = sadd.s32 %s496_s10, %s495_s4  ;;  %s1091_s12 = int_to_ptr.vmem [resolvable:$true] %s185_s12 }
  0x47   : > { %s497_s28 = sshll.u32 %s182_s3, 7  ;;  %p1097_p4 = pnand %p639_p11, %p1072_p13 }
  0x48   : > { %s1104_s26 = scalar_lea.hbm %s1266_s0, %s497_s28  ;;  %s1106_s29 = scalar_lea.sflag [#allocation3], %s171_s23 }
  0x49   : > { %s763_s3 = scalar_lea.hbm %s1104_s26, 512  ;;  %p765_p6 = pneg %p1097_p4 }
  0x4a   : > { %p764_p5 = scmp.ne.s32.totalorder %s1104_s26, %s763_s3  ;;  %s768_s15 = scalar_lea.hbm %s1266_s0, 3072 }
  0x4b   : > { %p769_p12 = scmp.lt.u32.totalorder %s1104_s26, %s1266_s0  ;;  %p770_p1 = scmp.lt.u32.totalorder %s768_s15, %s763_s3 }
  0x4c   : > { %p766_p8 = pnand %p765_p6, %p764_p5  ;;  %p772_p7 = scmp.lt.u32.totalorder %s763_s3, %s1104_s26 }
  0x4d   : > { %p771_p3 = por %p770_p1, %p769_p12 }
  0x4e   : > { %p767_p10 = pneg %p766_p8 }
  0x4f   : > { %p773_p9 = por %p772_p7, %p771_p3 }
  0x51   : > { %p774_p11 = pnand %p773_p9, %p767_p10 }
  0x53   : > { %777 = shalt.err (!%p774_p11)
}
  0x54   : > { %s778_s23 = scalar_lea.vmem %s1091_s12, 512  ;;  %s924_s24 = smov [#allocation2]  }
  0x55   : > { %p779_p13 = scmp.ne.s32.totalorder %s1091_s12, %s778_s23  ;;  %s783_s9 = sshll.u32 %s924_s24, 4  ;;  %s784_s9 = int_to_ptr.vmem [resolvable:$false] %s783_s9 }
  0x56   : > { %s785_s6 = scalar_lea.vmem %s784_s9, 1024  ;;  %p786_p5 = scmp.lt.s32.totalorder %s1091_s12, %s784_s9 }
  0x57   : > { %p781_p0 = pnand %p779_p13, %p765_p6  ;;  %p787_p8 = scmp.lt.s32.totalorder %s785_s6, %s778_s23 }
  0x59   : > { %p782_p2 = pneg %p781_p0  ;;  %p788_p12 = por %p787_p8, %p786_p5 }
  0x5b   : > { %p789_p1 = pnand %p788_p12, %p782_p2 }
  0x5d   : > { %792 = shalt.err (!%p789_p1)
}
  0x5e   : > { %s1300_s8 = smov 8   ;;  %s1301_s3 = smov 128  }
  0x5f   : > { %633 = dma.hbm_to_vmem [thread:$0]  (!%p1097_p4), %s1104_s26, 512, %s1091_s12, %s1106_s29, %s1301_s3, %s1301_s3, %s1300_s8  }
  0x60   : > { %p1302_p6 = scmp.ne.s32.totalorder %s1293_s30, 0 }
  0x61   : > { %s199_s4 = sand.u32 (!%p1302_p6), 1, %s895_s16   ;;  %p1303_p10 = scmp.ne.s32.totalorder (!%p1302_p6), %s1288_s27, 0 }
  0x62   : > { %197 = sbr.rel (%p1302_p6) target bundleno = 385 (0x181), region = 32  ;;  %s499_s10 = sshll.u32 (!%p1302_p6), %s199_s4, 5 }
  0x63   : > { %s200_s15 = scalar_lea.sflag (!%p1302_p6), [#allocation3], %s199_s4  ;;  %s1140_s28 = scalar_lea.vmem (!%p1302_p6), [#allocation2], %s499_s10 }
  0x69   : > { %866 = dma.done.wait (%p1303_p10), %s200_s15, 512  }
  0x6a   : > { %868 = vsyncadd (%p1303_p10), %s200_s15, 4294966784  ;;  %p1304_p3 = scmp.ne.s32.totalorder %s1287_s25, 0 }
  0x6c   : > { %870 = dma.done.wait (%p1304_p3), [#allocation6], 6144  }
  0x6d   : > { %872 = vsyncadd (%p1304_p3), [#allocation6], 4294961152  ;;  %s227_s12 = sand.u32 1, %s883_s13   ;;  %p232_p4 = scmp.eq.s32.totalorder %s903_s18, 0 }
  0x6e   : > { %s501_s30 = sshll.u32 %s227_s12, 5  ;;  %v503_v0 = vld [vmem:[%s1268_s2] ss:$0 sm:$0xff] (%p232_p4) }
  0x6f   : > { %s1154_s11 = scalar_lea.vmem [#allocation7], %s501_s30  ;;  %237 = sbr.rel (!%p232_p4) target bundleno = 118 (0x76), region = 44 }
  0x70   : > { %245 = vst [vmem:[%s1154_s11] sm:$0xff] (%p232_p4), %v503_v0  ;;  %246 = vst [vmem:[%s1154_s11 + $0x8] sm:$0xff] (%p232_p4), %v503_v0 }
  0x71   : > { %247 = vst [vmem:[%s1154_s11 + $0x10] sm:$0xff] (%p232_p4), %v503_v0  ;;  %248 = vst [vmem:[%s1154_s11 + $0x18] sm:$0xff] (%p232_p4), %v503_v0 }
  0x76 PF: > { %s504_s25 = sshll.u32 %s903_s18, 7  ;;  %v256_v1 = vld [vmem:[%s1140_s28] sm:$0xff]  ;;  %v258_v2 = vld [vmem:[%s1140_s28 + $0x10] sm:$0xff]  ;;  %v257_v27 = vld [vmem:[%s1140_s28 + $0x8] sm:$0xff]  ;;  %s511_s18 = sshll.u32 %s907_s19, 9 }
  0x77   : > { %564 = vmatprep.mubr.f32.mxu0 %v256_v1  ;;  %567 = vmatprep.mubr.f32.mxu1 %v258_v2  ;;  %s1166_s27 = scalar_lea.vmem [#allocation5], %s504_s25  ;;  %v259_v28 = vld [vmem:[%s1140_s28 + $0x18] sm:$0xff]  ;;  %v253_v29 = vld [vmem:[%s1154_s11 + $0x8] sm:$0xff]  ;;  %s384_s5 = sshll.u32 %s1154_s11, 4  ;;  %v252_v31 = vld [vmem:[%s1154_s11] sm:$0xff]  ;;  %s1197_s5 = int_to_ptr.vmem [resolvable:$true] %s384_s5 }
  0x78   : > { %v261_v3 = vld [vmem:[%s1166_s27] sm:$0xff]  ;;  %v262_v4 = vld [vmem:[%s1166_s27 + $0x8] sm:$0xff]  ;;  %v263_v5 = vld [vmem:[%s1166_s27 + $0x10] sm:$0xff]  ;;  %s1305_s23 = sld [smem:[#allocation12_spill]]  ;;  %s1306_s6 = sld [smem:[#allocation17_spill]] }
  0x79   : > { %v570_v6 = vpack.c.bf16 %v262_v4, %v261_v3  ;;  %v264_v7 = vld [vmem:[%s1166_s27 + $0x18] sm:$0xff]  ;;  %v265_v9 = vld [vmem:[%s1166_s27 + $0x20] sm:$0xff]  ;;  %v266_v10 = vld [vmem:[%s1166_s27 + $0x28] sm:$0xff]  ;;  %s1205_s19 = scalar_lea.sflag [#allocation4], %s227_s12  ;;  %s793_s3 = scalar_lea.vmem %s1197_s5, 512 }
  0x7a   : > { %v574_v8 = vpack.c.bf16 %v264_v7, %v263_v5  ;;  %v578_v11 = vpack.c.bf16 %v266_v10, %v265_v9  ;;  %v267_v12 = vld [vmem:[%s1166_s27 + $0x30] sm:$0xff]  ;;  %v268_v13 = vld [vmem:[%s1166_s27 + $0x38] sm:$0xff]  ;;  %v269_v15 = vld [vmem:[%s1166_s27 + $0x40] sm:$0xff]  ;;  %p794_p7 = scmp.ne.s32.totalorder %s1197_s5, %s793_s3  ;;  %s925_s4 = smov [#allocation7]  }
  0x7b   : > { %571 = vmatprep.subr.bf16.mxu0 %v570_v6  ;;  %602 = vmatprep.subr.bf16.mxu1 %v570_v6  ;;  %v582_v14 = vpack.c.bf16 %v268_v13, %v267_v12  ;;  %v270_v16 = vld [vmem:[%s1166_s27 + $0x48] sm:$0xff]  ;;  %v271_v18 = vld [vmem:[%s1166_s27 + $0x50] sm:$0xff]  ;;  %v272_v19 = vld [vmem:[%s1166_s27 + $0x58] sm:$0xff]  ;;  %s797_s10 = sshll.u32 %s925_s4, 4  ;;  %s798_s10 = int_to_ptr.vmem [resolvable:$false] %s797_s10 }
  0x7c   : > { %573 = vmatpush3.bf16.msra.mxu0 %v570_v6  ;;  %610 = vmatpush3.bf16.msra.mxu1 %v570_v6  ;;  %v586_v17 = vpack.c.bf16 %v270_v16, %v269_v15  ;;  %v590_v20 = vpack.c.bf16 %v272_v19, %v271_v18  ;;  %v273_v21 = vld [vmem:[%s1166_s27 + $0x60] sm:$0xff]  ;;  %v274_v22 = vld [vmem:[%s1166_s27 + $0x68] sm:$0xff]  ;;  %v275_v24 = vld [vmem:[%s1166_s27 + $0x70] sm:$0xff]  ;;  %s799_s15 = scalar_lea.vmem %s798_s10, 1024  ;;  %p800_p0 = scmp.lt.s32.totalorder %s1197_s5, %s798_s10 }
  0x7d   : > { %575 = vmatprep.subr.bf16.mxu0 %v574_v8  ;;  %603 = vmatprep.subr.bf16.mxu1 %v574_v8  ;;  %v594_v23 = vpack.c.bf16 %v274_v22, %v273_v21  ;;  %v276_v25 = vld [vmem:[%s1166_s27 + $0x78] sm:$0xff]  ;;  %v254_v32 = vld [vmem:[%s1154_s11 + $0x10] sm:$0xff]  ;;  %p801_p2 = scmp.lt.s32.totalorder %s799_s15, %s793_s3 }
  0x7e   : > { %v598_v26 = vpack.c.bf16 %v276_v25, %v275_v24  ;;  %v255_v30 = vld [vmem:[%s1154_s11 + $0x18] sm:$0xff]  ;;  %s1195_s8 = scalar_lea.hbm %s1306_s6, %s511_s18  ;;  %p1307_p9 = scmp.ne.s32.totalorder %s1305_s23, 0 }
  0x7f   : > { %p802_p5 = por %p801_p2, %p800_p0 }
  0x80   : > { %577 = vmatpush3.bf16.msra.mxu0 %v574_v8  ;;  %611 = vmatpush3.bf16.msra.mxu1 %v574_v8  ;;  %p795_p11 = pnand %p794_p7, %p1307_p9 }
  0x81   : > { %579 = vmatprep.subr.bf16.mxu0 %v578_v11  ;;  %604 = vmatprep.subr.bf16.mxu1 %v578_v11 }
  0x82   : > { %p796_p13 = pneg %p795_p11 }
  0x84   : > { %581 = vmatpush3.bf16.msra.mxu0 %v578_v11  ;;  %612 = vmatpush3.bf16.msra.mxu1 %v578_v11  ;;  %p803_p8 = pnand %p802_p5, %p796_p13 }
  0x85   : > { %583 = vmatprep.subr.bf16.mxu0 %v582_v14  ;;  %605 = vmatprep.subr.bf16.mxu1 %v582_v14 }
  0x88   : > { %585 = vmatpush3.bf16.msra.mxu0 %v582_v14  ;;  %613 = vmatpush3.bf16.msra.mxu1 %v582_v14 }
  0x89   : > { %587 = vmatprep.subr.bf16.mxu0 %v586_v17  ;;  %606 = vmatprep.subr.bf16.mxu1 %v586_v17 }
  0x8c   : > { %589 = vmatpush3.bf16.msra.mxu0 %v586_v17  ;;  %614 = vmatpush3.bf16.msra.mxu1 %v586_v17 }
  0x8d   : > { %591 = vmatprep.subr.bf16.mxu0 %v590_v20  ;;  %607 = vmatprep.subr.bf16.mxu1 %v590_v20 }
  0x90   : > { %593 = vmatpush3.bf16.msra.mxu0 %v590_v20  ;;  %615 = vmatpush3.bf16.msra.mxu1 %v590_v20 }
  0x91   : > { %595 = vmatprep.subr.bf16.mxu0 %v594_v23  ;;  %608 = vmatprep.subr.bf16.mxu1 %v594_v23 }
  0x94   : > { %597 = vmatpush3.bf16.msra.mxu0 %v594_v23  ;;  %616 = vmatpush3.bf16.msra.mxu1 %v594_v23 }
  0x95   : > { %599 = vmatprep.subr.bf16.mxu0 %v598_v26  ;;  %609 = vmatprep.subr.bf16.mxu1 %v598_v26 }
  0x98   : > { %601 = vmatpush3.bf16.msra.mxu0 %v598_v26  ;;  %617 = vmatpush3.bf16.msra.mxu1 %v598_v26 }
  0x9b   : > { %565 = vmatmul.mubr.f32.vlgmr.msra.gmra.mrb[0].mxu0 %v257_v27  ;;  %568 = vmatmul.mubr.f32.vlgmr.msra.gmra.mrb[0].mxu1 %v259_v28 }
 0x16e   : > { %v566_v33 = vpop.f32.mrb[0].mxu0  ;;  %v569_v34 = vpop.f32.mrb[0].mxu1 }
 0x16f   : > { %v363_v35 = vadd.f32 %v566_v33, %v253_v29  ;;  %v365_v36 = vadd.f32 %v569_v34, %v255_v30  ;;  %v343_v37 = vpop.f32.mrb[1].mxu0  ;;  %v353_v38 = vpop.f32.mrb[1].mxu1 }
 0x170   : > { %v362_v39 = vadd.f32 %v343_v37, %v252_v31  ;;  %v364_v40 = vadd.f32 %v353_v38, %v254_v32 }
 0x171   : > { %367 = vst [vmem:[%s1154_s11 + $0x8] sm:$0xff] %v363_v35  ;;  %369 = vst [vmem:[%s1154_s11 + $0x18] sm:$0xff] %v365_v36 }
 0x172   : > { %366 = vst [vmem:[%s1154_s11] sm:$0xff] %v362_v39  ;;  %368 = vst [vmem:[%s1154_s11 + $0x10] sm:$0xff] %v364_v40 }
 0x173   : > { %806 = shalt.err (!%p803_p8)
}
 0x174   : > { %s807_s28 = scalar_lea.hbm %s1195_s8, 512  ;;  %s811_s11 = scalar_lea.hbm %s1306_s6, 1024 }
 0x175   : > { %p808_p12 = scmp.ne.s32.totalorder %s1195_s8, %s807_s28  ;;  %p812_p10 = scmp.lt.u32.totalorder %s1195_s8, %s1306_s6 }
 0x176   : > { %p813_p3 = scmp.lt.u32.totalorder %s811_s11, %s807_s28  ;;  %p815_p7 = scmp.lt.u32.totalorder %s807_s28, %s1195_s8 }
 0x177   : > { %p809_p1 = pnand %p808_p12, %p1307_p9 }
 0x178   : > { %p814_p4 = por %p813_p3, %p812_p10 }
 0x179   : > { %p810_p6 = pneg %p809_p1 }
 0x17a   : > { %p816_p11 = por %p815_p7, %p814_p4 }
 0x17c   : > { %p817_p13 = pnand %p816_p11, %p810_p6 }
 0x17e   : > { %820 = shalt.err (!%p817_p13)
}
 0x17f   : > { %s926_s25 = smov 128   ;;  %s927_s27 = smov 8  }
 0x180   : > { %624 = dma.vmem_to_hbm [thread:$0]  (%p1307_p9), %s1197_s5, 512, %s1195_s8, %s1205_s19, %s926_s25, %s926_s25, %s927_s27  }
 0x181 PF: > { %s1308_s18 = sld [smem:[#allocation11_spill]]  ;;  %s1309_s24 = sld [smem:[#allocation13_spill]] }
 0x182   : > { %p641_p0 = scmp.ge.s32.totalorder %s919_s22, 2 }
 0x187   : > { %s399_s9 = sand.u32 1, %s1308_s18   ;;  %p1310_p2 = scmp.ne.s32.totalorder %s1309_s24, 0 }
 0x188   : > { %s400_s3 = scalar_lea.sflag [#allocation4], %s399_s9 }
 0x189   : > { %p635_p5 = pnand %p641_p0, %p1310_p2 }
 0x18b   : > { %874 = dma.done.wait (!%p635_p5), %s400_s3, 512  }
 0x18c   : > { %876 = vsyncadd (!%p635_p5), %s400_s3, 4294966784  ;;  %s20_s22 = sadd.s32 1, %s919_s22   ;;  %s1311_s5 = sld [smem:[#allocation14_spill]] }
 0x18d   : > { %p17_p8 = scmp.ge.s32.totalorder %s20_s22, 8   ;;  %s1312_s23 = sld [smem:[#allocation15_spill]] }
 0x18e   : > { %s1313_s12 = smov %s883_s13  ;;  %s1314_s13 = smov %s887_s14 }
 0x18f   : > { %s1315_s14 = smov %s1085_s7  ;;  %s1316_s15 = smov %s895_s16 }
 0x190   : > { %s1317_s16 = smov %s899_s17  ;;  %s1318_s17 = smov %s1088_s1 }
 0x191   : > { %s1319_s18 = smov %s911_s20  ;;  %s1320_s19 = smov %s915_s21 }
 0x192   : > { %s1321_s20 = smov %s1311_s5  ;;  %19 = sbr.rel (!%p17_p8) target bundleno = 13 (0xd), region = 86 }
 0x193   : > { %s1322_s21 = smov %s1312_s23 }
 0x199   :  { %405 = vsyncpa [#allocation3], 1 }
 0x19a   :  { %407 = vsyncpa [#allocation3 + $0x1], 1 }
 0x19b   :  { %408 = vsyncpa [#allocation6], 1 }
 0x19c   :  { %409 = vsyncpa [#allocation4], 1 }
 0x19d   :  { %411 = vsyncpa [#allocation4 + $0x1], 1 }

</bundles_post_ra>
